<compile_context>
chip_gen: v7x
topology: tpu7x:2x2x1
jax: 0.10.0
libtpu: 0.0.40
codegen_flags: <defaults>
</compile_context>

<pallas_src>
import jax
import jax.numpy as jnp
from jax import lax
from jax.experimental import pallas as pl
from jax.experimental.pallas import tpu as pltpu


def _round_up(x, m):
    return ((x + m - 1) // m) * m


def _cdiv(a, b):
    return -(-a // b)


def _vmem_capacity_bytes():
    """Physical VMEM per TensorCore; conservative (v7x) fallback if unknown."""
    try:
        info = pltpu.get_tpu_info()
        cap = getattr(info, "vmem_capacity_bytes", None)
        if cap:
            return int(cap)
    except Exception:
        pass
    return 64 * 1024 * 1024


def _choose_tiling(R, itemsize, n_in, input_budget, max_tile_rows=None):
    """Balanced k tiling.  rows_per_tile is aligned to the dtype's native
    sublane packing and sized so double-buffered inputs fit input_budget."""
    sub = 8 * max(1, 4 // max(1, itemsize))        # 8 f32 / 16 bf16 / 32 int8
    bytes_per_row = n_in * 2 * 128 * itemsize      # 2x = double buffering
    cap_rows = max(sub, (input_budget // bytes_per_row) // sub * sub)
    if max_tile_rows is not None:
        cap_rows = max(sub, min(cap_rows, (max_tile_rows // sub) * sub))
    num_k = max(1, _cdiv(R, cap_rows))
    rows_per_tile = min(cap_rows, _round_up(_cdiv(R, num_k), sub))
    num_k = max(1, _cdiv(R, rows_per_tile))
    return rows_per_tile, num_k


def _make_stats_kernel(n_in, rows_per_tile, num_k, k_per_split, tail_rows,
                       n_split):
    """Builds the accumulation kernel.

    Refs: (pred, gt[, coarse], out, acc_abs_p, acc_sq_p[, acc_abs_c, acc_sq_c])
      inputs : (1, rows_per_tile, 128) blocks of the (B, R, 128) streams
      out    : (1, 1, n_stats*8, 128) per-(split, batch) raw accumulators
      acc_*  : (8, 128) f32 VMEM scratch
    """
    n_pairs = n_in - 1
    rows_sub = rows_per_tile // 8
    has_empty = (n_split * k_per_split != num_k)

    def kernel(*refs):
        in_refs = refs[:n_in]
        out_ref = refs[n_in]
        acc_refs = refs[n_in + 1:]

        s = pl.program_id(0)
        k = pl.program_id(2)
        k_global = s * k_per_split + k

        @pl.when(k == 0)
        def _():
            for acc in acc_refs:
                acc[...] = jnp.zeros_like(acc)

        def accumulate(valid_rows):
            g = in_refs[1][0].astype(jnp.float32)
            for j in range(n_pairs):
                x_ref = in_refs[0] if j == 0 else in_refs[2]
                d = x_ref[0].astype(jnp.float32) - g
                if valid_rows is not None:
                    row = lax.broadcasted_iota(jnp.int32, d.shape, 0)
                    d = jnp.where(row < valid_rows, d, 0.0)
                # In-register tree reduce of the tile down to one (8,128) vreg
                # per stat (pure VPU adds), then a single accumulator update.
                acc_refs[2 * j][...] += jnp.sum(
                    jnp.abs(d).reshape(rows_sub, 8, 128), axis=0)
                acc_refs[2 * j + 1][...] += jnp.sum(
                    (d * d).reshape(rows_sub, 8, 128), axis=0)

        if tail_rows == 0 and not has_empty:
            accumulate(None)                       # every block is full
        elif tail_rows == 0:
            @pl.when(k_global < num_k)             # skip clamped empty blocks
            def _():
                accumulate(None)
        else:
            @pl.when(k_global < num_k - 1)         # steady-state: no masking
            def _():
                accumulate(None)

            @pl.when(k_global == num_k - 1)        # ragged last block: mask
            def _():
                accumulate(tail_rows)
            # k_global >= num_k (empty, clamped DMA): accumulate nothing.

        @pl.when(k == k_per_split - 1)
        def _():
            for j in range(2 * n_pairs):           # direct slice stores
                out_ref[0, 0, pl.ds(j * 8, 8), :] = acc_refs[j][...]

    return kernel


def _per_batch_stats(arrs, max_tile_rows=None):
    """arrs: list of (B, R, 128) arrays (pred, gt[, coarse]).
    Returns (B, n_stats) f32:
      [sum|pred-gt|, sum(pred-gt)^2 [, sum|coarse-gt|, sum(coarse-gt)^2]]."""
    n_in = len(arrs)
    n_pairs = n_in - 1
    n_stats = 2 * n_pairs
    B, R, _ = arrs[0].shape
    itemsize = arrs[0].dtype.itemsize

    cap = _vmem_capacity_bytes()
    input_budget = max(16 << 20, cap // 2 - (8 << 20))       # 56 MiB @128, 24 MiB @64
    vmem_limit = int(min(cap - (16 << 20), input_budget + (8 << 20)))

    rows_per_tile, num_k = _choose_tiling(R, itemsize, n_in, input_budget,
                                          max_tile_rows)
    # Expose a 2nd parallel axis so both v7x TensorCores are fed when B is 1/odd.
    n_split = 2 if (num_k >= 2 and B % 2 == 1) else 1
    k_per_split = _cdiv(num_k, n_split)
    tail_rows = R % rows_per_tile

    kernel = _make_stats_kernel(n_in, rows_per_tile, num_k, k_per_split,
                                tail_rows, n_split)

    def in_map(s, b, k):
        # Clamp so the (rare) empty trailing blocks of the last split never
        # DMA out of bounds; their data is never accumulated.
        return (b, jnp.minimum(s * k_per_split + k, num_k - 1), 0)

    in_spec = pl.BlockSpec((1, rows_per_tile, 128), in_map)
    out_spec = pl.BlockSpec((1, 1, n_stats * 8, 128), lambda s, b, k: (s, b, 0, 0))

    out_bytes = n_split * B * n_stats * 8 * 128 * 4
    cost = pl.CostEstimate(
        flops=6 * n_pairs * B * R * 128,
        transcendentals=0,
        bytes_accessed=int(sum(int(a.size) for a in arrs) * itemsize + out_bytes))

    out = pl.pallas_call(
        kernel,
        out_shape=jax.ShapeDtypeStruct((n_split, B, n_stats * 8, 128),
                                       jnp.float32),
        grid_spec=pltpu.PrefetchScalarGridSpec(
            num_scalar_prefetch=0,
            grid=(n_split, B, k_per_split),
            in_specs=[in_spec] * n_in,
            out_specs=out_spec,
            scratch_shapes=[pltpu.VMEM((8, 128), jnp.float32)
                            for _ in range(n_stats)]),
        compiler_params=pltpu.CompilerParams(
            dimension_semantics=("parallel", "parallel", "arbitrary"),
            vmem_limit_bytes=vmem_limit),
        cost_estimate=cost,
    )(*arrs)

    # (n_split, B, n_stats*8, 128) -> (B, n_stats): tiny lane/sublane/split sum.
    return out.reshape(n_split, B, n_stats, 8 * 128).sum(axis=(0, 3))


def synthesis_loss(pred_img, gt_img, coarse=None, lambdas=(1.0, 1.0, 1.0),
                   max_tile_rows=None):
    """JAX/Pallas equivalent of SynthesisLoss.forward with losses=[l1,l2,PSNR]."""
    B, C, H, W = gt_img.shape

    # SynthesisLoss crops pred to gt's spatial extent (copy only if needed).
    if pred_img.shape[-2] != H or pred_img.shape[-1] != W:
        # TODO(synk): fold the crop into the kernel's index_map over the NCHW
        # layout to avoid materializing this strided-slice copy.
        pred = pred_img[:, :, :H, :W]
    else:
        pred = pred_img

    has_coarse = coarse is not None
    L = C * H * W
    flats = [pred.reshape(B, L), gt_img.reshape(B, L)]
    if has_coarse:
        flats.append(coarse.reshape(B, L))

    # Lane-align only the (<128-elem) tail; sublane/row raggedness is masked
    # inside the kernel, so no rows_per_tile-granular pad copies.
    R = _cdiv(L, 128)
    lane_pad = R * 128 - L
    if lane_pad:
        # TODO(synk): this rare path still costs one pad copy per input; it
        # could be replaced with a tiny jnp epilogue over the last L%128 elems.
        flats = [jnp.pad(f, ((0, 0), (0, lane_pad))) for f in flats]
    arrs = [f.reshape(B, R, 128) for f in flats]

    stats = _per_batch_stats(arrs, max_tile_rows=max_tile_rows)   # (B, n_stats)

    n_total = B * L
    abs_p, sq_p = stats[:, 0], stats[:, 1]
    l1 = jnp.sum(abs_p) / n_total
    l2 = jnp.sum(sq_p) / n_total
    if has_coarse:
        abs_c, sq_c = stats[:, 2], stats[:, 3]
        l1 = l1 + jnp.sum(abs_c) / n_total
        l2 = l2 + jnp.sum(sq_c) / n_total

    # PSNR: images mapped by x*0.5+0.5, so the diff scales by 0.5 -> sq by 0.25.
    # mse_err_b = sum_{c,h,w}(0.5*diff)^2 / (H*W).  Tiny clamp avoids +inf when
    # pred == gt exactly (the reference would return +inf there).
    mse_b = jnp.maximum(0.25 * sq_p / (H * W), 1e-12)
    psnr = jnp.mean(10.0 * jnp.log10(1.0 / mse_b))

    # Aggregation identical to SynthesisLoss.forward (first lambda unused,
    # PSNR contributes no 'Total Loss').
    total = l1 + lambdas[1] * l2
    return {'L2': l2, 'L1': l1, 'psnr': psnr, 'Total Loss': total}


def _reference(pred_img, gt_img, coarse=None):
    """Pure-JAX reference of the same semantics (sanity check)."""
    B, C, H, W = gt_img.shape
    p = pred_img[:, :, :H, :W].astype(jnp.float32)
    g = gt_img.astype(jnp.float32)
    l1 = jnp.mean(jnp.abs(p - g))
    l2 = jnp.mean((p - g) ** 2)
    if coarse is not None:
        c = coarse.astype(jnp.float32)
        l1 = l1 + jnp.mean(jnp.abs(c - g))
        l2 = l2 + jnp.mean((c - g) ** 2)
    dp = (p * 0.5 + 0.5) - (g * 0.5 + 0.5)
    mse_b = jnp.mean(jnp.sum(dp * dp, axis=1).reshape(B, -1), axis=1)
    psnr = jnp.mean(10.0 * jnp.log10(1.0 / mse_b))
    return {'L2': l2, 'L1': l1, 'psnr': psnr, 'Total Loss': l1 + l2}


def _check(out, ref):
    for name in ('L1', 'L2', 'psnr', 'Total Loss'):
        a, b = float(out[name]), float(ref[name])
        assert abs(a - b) <= 1e-4 * max(1.0, abs(b)), (name, a, b)


if __name__ == "__main__":
    key = jax.random.PRNGKey(0)
    k1, k2, k3, k4, k5, k6 = jax.random.split(key, 6)

    # Case 1: B=2, pred spatially larger than gt (exercises the crop),
    # 3-input kernel, full-tile fast path.
    pred_img = jax.random.normal(k1, (2, 4, 18, 18), dtype=jnp.float32)
    gt_img = jax.random.normal(k2, (2, 4, 16, 16), dtype=jnp.float32)
    coarse = jax.random.normal(k3, (2, 4, 16, 16), dtype=jnp.float32)

    out = synthesis_loss(pred_img, gt_img, coarse)
    out = jax.tree_util.tree_map(jax.block_until_ready, out)
    _check(out, _reference(pred_img, gt_img, coarse))

    # Case 2: coarse=None fast path (2-input kernel).
    out_nc = synthesis_loss(pred_img, gt_img, None)
    out_nc = jax.tree_util.tree_map(jax.block_until_ready, out_nc)
    _check(out_nc, _reference(pred_img, gt_img, None))

    # Case 3: B=1 with a forced small tile so the kernel exercises the 2-way
    # k-split (v7x dual-TC path), the masked ragged last block, and the
    # clamped empty trailing block.
    pred1 = jax.random.normal(k4, (1, 10, 16, 16), dtype=jnp.float32)
    gt1 = jax.random.normal(k5, (1, 10, 16, 16), dtype=jnp.float32)
    coarse1 = jax.random.normal(k6, (1, 10, 16, 16), dtype=jnp.float32)
    out1 = synthesis_loss(pred1, gt1, coarse1, max_tile_rows=8)
    out1 = jax.tree_util.tree_map(jax.block_until_ready, out1)
    _check(out1, _reference(pred1, gt1, coarse1))

    print("KERNEL_OK")
</pallas_src>

<mosaic_0001>
module attributes {stable_mosaic.version = 11 : i64} {
  func.func @kernel(%arg0: i32, %arg1: i32, %arg2: i32, %arg3: memref<1x8x128xf32, #tpu.memory_space<vmem>>, %arg4: memref<1x8x128xf32, #tpu.memory_space<vmem>>, %arg5: memref<1x8x128xf32, #tpu.memory_space<vmem>>, %arg6: memref<1x1x32x128xf32, #tpu.memory_space<vmem>>, %arg7: memref<8x128xf32, #tpu.memory_space<vmem>>, %arg8: memref<8x128xf32, #tpu.memory_space<vmem>>, %arg9: memref<8x128xf32, #tpu.memory_space<vmem>>, %arg10: memref<8x128xf32, #tpu.memory_space<vmem>>) attributes {dimension_semantics = [#tpu.dimension_semantics<parallel>, #tpu.dimension_semantics<parallel>, #tpu.dimension_semantics<arbitrary>], iteration_bounds = array<i64: 1, 2, 1>, scalar_prefetch = 0 : i64, scratch_operands = 4 : i64, tpu.core_type = #tpu.core_type<tc>, window_params = [{transform_indices = @transform_0, window_bounds = array<i64: 1, 8, 128>}, {transform_indices = @transform_1, window_bounds = array<i64: 1, 8, 128>}, {transform_indices = @transform_2, window_bounds = array<i64: 1, 8, 128>}, {transform_indices = @transform_3, window_bounds = array<i64: 1, 1, 32, 128>}]} {
    %c0_i32 = arith.constant 0 : i32
    %0 = arith.cmpi eq, %arg2, %c0_i32 : i32
    %1 = arith.extui %0 : i1 to i32
    %c0_i32_0 = arith.constant 0 : i32
    %2 = arith.cmpi ne, %1, %c0_i32_0 : i32
    scf.if %2 {
      %cst_30 = arith.constant 0.000000e+00 : f32
      %38 = vector.broadcast %cst_30 : f32 to vector<8x128xf32>
      %c0_31 = arith.constant 0 : index
      %c0_32 = arith.constant 0 : index
      %39 = vector.load %arg7[%c0_31, %c0_32] : memref<8x128xf32, #tpu.memory_space<vmem>>, vector<8x128xf32>
      tpu.vector_store %arg7[%c0_31, %c0_32], %38 {strides = array<i32>} : memref<8x128xf32, #tpu.memory_space<vmem>>, vector<8x128xf32>,
      %cst_33 = arith.constant 0.000000e+00 : f32
      %40 = vector.broadcast %cst_33 : f32 to vector<8x128xf32>
      %c0_34 = arith.constant 0 : index
      %c0_35 = arith.constant 0 : index
      %41 = vector.load %arg8[%c0_34, %c0_35] : memref<8x128xf32, #tpu.memory_space<vmem>>, vector<8x128xf32>
      tpu.vector_store %arg8[%c0_34, %c0_35], %40 {strides = array<i32>} : memref<8x128xf32, #tpu.memory_space<vmem>>, vector<8x128xf32>,
      %cst_36 = arith.constant 0.000000e+00 : f32
      %42 = vector.broadcast %cst_36 : f32 to vector<8x128xf32>
      %c0_37 = arith.constant 0 : index
      %c0_38 = arith.constant 0 : index
      %43 = vector.load %arg9[%c0_37, %c0_38] : memref<8x128xf32, #tpu.memory_space<vmem>>, vector<8x128xf32>
      tpu.vector_store %arg9[%c0_37, %c0_38], %42 {strides = array<i32>} : memref<8x128xf32, #tpu.memory_space<vmem>>, vector<8x128xf32>,
      %cst_39 = arith.constant 0.000000e+00 : f32
      %44 = vector.broadcast %cst_39 : f32 to vector<8x128xf32>
      %c0_40 = arith.constant 0 : index
      %c0_41 = arith.constant 0 : index
      %45 = vector.load %arg10[%c0_40, %c0_41] : memref<8x128xf32, #tpu.memory_space<vmem>>, vector<8x128xf32>
      tpu.vector_store %arg10[%c0_40, %c0_41], %44 {strides = array<i32>} : memref<8x128xf32, #tpu.memory_space<vmem>>, vector<8x128xf32>,
    } else {
    }
    %c0 = arith.constant 0 : index
    %c0_1 = arith.constant 0 : index
    %c0_2 = arith.constant 0 : index
    %3 = vector.load %arg4[%c0, %c0_1, %c0_2] : memref<1x8x128xf32, #tpu.memory_space<vmem>>, vector<1x8x128xf32>
    %4 = vector.shape_cast %3 : vector<1x8x128xf32> to vector<8x128xf32>
    %c0_3 = arith.constant 0 : index
    %c0_4 = arith.constant 0 : index
    %c0_5 = arith.constant 0 : index
    %5 = vector.load %arg3[%c0_3, %c0_4, %c0_5] : memref<1x8x128xf32, #tpu.memory_space<vmem>>, vector<1x8x128xf32>
    %6 = vector.shape_cast %5 : vector<1x8x128xf32> to vector<8x128xf32>
    %7 = arith.subf %6, %4 : vector<8x128xf32>
    %c0_6 = arith.constant 0 : index
    %c0_7 = arith.constant 0 : index
    %8 = vector.load %arg7[%c0_6, %c0_7] : memref<8x128xf32, #tpu.memory_space<vmem>>, vector<8x128xf32>
    %9 = math.absf %7 : vector<8x128xf32>
    %10 = vector.shape_cast %9 : vector<8x128xf32> to vector<1x8x128xf32>
    %cst = arith.constant dense<0.000000e+00> : vector<8x128xf32>
    %11 = vector.multi_reduction <add>, %10, %cst [0] : vector<1x8x128xf32> to vector<8x128xf32>
    %12 = arith.addf %8, %11 : vector<8x128xf32>
    %c0_8 = arith.constant 0 : index
    %c0_9 = arith.constant 0 : index
    %13 = vector.load %arg7[%c0_8, %c0_9] : memref<8x128xf32, #tpu.memory_space<vmem>>, vector<8x128xf32>
    tpu.vector_store %arg7[%c0_8, %c0_9], %12 {strides = array<i32>} : memref<8x128xf32, #tpu.memory_space<vmem>>, vector<8x128xf32>,
    %c0_10 = arith.constant 0 : index
    %c0_11 = arith.constant 0 : index
    %14 = vector.load %arg8[%c0_10, %c0_11] : memref<8x128xf32, #tpu.memory_space<vmem>>, vector<8x128xf32>
    %15 = arith.mulf %7, %7 : vector<8x128xf32>
    %16 = vector.shape_cast %15 : vector<8x128xf32> to vector<1x8x128xf32>
    %cst_12 = arith.constant dense<0.000000e+00> : vector<8x128xf32>
    %17 = vector.multi_reduction <add>, %16, %cst_12 [0] : vector<1x8x128xf32> to vector<8x128xf32>
    %18 = arith.addf %14, %17 : vector<8x128xf32>
    %c0_13 = arith.constant 0 : index
    %c0_14 = arith.constant 0 : index
    %19 = vector.load %arg8[%c0_13, %c0_14] : memref<8x128xf32, #tpu.memory_space<vmem>>, vector<8x128xf32>
    tpu.vector_store %arg8[%c0_13, %c0_14], %18 {strides = array<i32>} : memref<8x128xf32, #tpu.memory_space<vmem>>, vector<8x128xf32>,
    %c0_15 = arith.constant 0 : index
    %c0_16 = arith.constant 0 : index
    %c0_17 = arith.constant 0 : index
    %20 = vector.load %arg5[%c0_15, %c0_16, %c0_17] : memref<1x8x128xf32, #tpu.memory_space<vmem>>, vector<1x8x128xf32>
    %21 = vector.shape_cast %20 : vector<1x8x128xf32> to vector<8x128xf32>
    %22 = arith.subf %21, %4 : vector<8x128xf32>
    %c0_18 = arith.constant 0 : index
    %c0_19 = arith.constant 0 : index
    %23 = vector.load %arg9[%c0_18, %c0_19] : memref<8x128xf32, #tpu.memory_space<vmem>>, vector<8x128xf32>
    %24 = math.absf %22 : vector<8x128xf32>
    %25 = vector.shape_cast %24 : vector<8x128xf32> to vector<1x8x128xf32>
    %cst_20 = arith.constant dense<0.000000e+00> : vector<8x128xf32>
    %26 = vector.multi_reduction <add>, %25, %cst_20 [0] : vector<1x8x128xf32> to vector<8x128xf32>
    %27 = arith.addf %23, %26 : vector<8x128xf32>
    %c0_21 = arith.constant 0 : index
    %c0_22 = arith.constant 0 : index
    %28 = vector.load %arg9[%c0_21, %c0_22] : memref<8x128xf32, #tpu.memory_space<vmem>>, vector<8x128xf32>
    tpu.vector_store %arg9[%c0_21, %c0_22], %27 {strides = array<i32>} : memref<8x128xf32, #tpu.memory_space<vmem>>, vector<8x128xf32>,
    %c0_23 = arith.constant 0 : index
    %c0_24 = arith.constant 0 : index
    %29 = vector.load %arg10[%c0_23, %c0_24] : memref<8x128xf32, #tpu.memory_space<vmem>>, vector<8x128xf32>
    %30 = arith.mulf %22, %22 : vector<8x128xf32>
    %31 = vector.shape_cast %30 : vector<8x128xf32> to vector<1x8x128xf32>
    %cst_25 = arith.constant dense<0.000000e+00> : vector<8x128xf32>
    %32 = vector.multi_reduction <add>, %31, %cst_25 [0] : vector<1x8x128xf32> to vector<8x128xf32>
    %33 = arith.addf %29, %32 : vector<8x128xf32>
    %c0_26 = arith.constant 0 : index
    %c0_27 = arith.constant 0 : index
    %34 = vector.load %arg10[%c0_26, %c0_27] : memref<8x128xf32, #tpu.memory_space<vmem>>, vector<8x128xf32>
    tpu.vector_store %arg10[%c0_26, %c0_27], %33 {strides = array<i32>} : memref<8x128xf32, #tpu.memory_space<vmem>>, vector<8x128xf32>,
    %c0_i32_28 = arith.constant 0 : i32
    %35 = arith.cmpi eq, %arg2, %c0_i32_28 : i32
    %36 = arith.extui %35 : i1 to i32
    %c0_i32_29 = arith.constant 0 : i32
    %37 = arith.cmpi ne, %36, %c0_i32_29 : i32
    scf.if %37 {
      %c0_30 = arith.constant 0 : index
      %c0_31 = arith.constant 0 : index
      %38 = vector.load %arg7[%c0_30, %c0_31] : memref<8x128xf32, #tpu.memory_space<vmem>>, vector<8x128xf32>
      %c0_32 = arith.constant 0 : index
      %c0_33 = arith.constant 0 : index
      %c0_34 = arith.constant 0 : index
      %c0_35 = arith.constant 0 : index
      %39 = vector.load %arg6[%c0_32, %c0_33, %c0_34, %c0_35] : memref<1x1x32x128xf32, #tpu.memory_space<vmem>>, vector<1x1x8x128xf32>
      %40 = vector.shape_cast %39 : vector<1x1x8x128xf32> to vector<8x128xf32>
      %41 = vector.shape_cast %38 : vector<8x128xf32> to vector<1x1x8x128xf32>
      tpu.vector_store %arg6[%c0_32, %c0_33, %c0_34, %c0_35], %41 {strides = array<i32>} : memref<1x1x32x128xf32, #tpu.memory_space<vmem>>, vector<1x1x8x128xf32>,
      %c0_36 = arith.constant 0 : index
      %c0_37 = arith.constant 0 : index
      %42 = vector.load %arg8[%c0_36, %c0_37] : memref<8x128xf32, #tpu.memory_space<vmem>>, vector<8x128xf32>
      %c0_38 = arith.constant 0 : index
      %c0_39 = arith.constant 0 : index
      %c8 = arith.constant 8 : index
      %c0_40 = arith.constant 0 : index
      %43 = vector.load %arg6[%c0_38, %c0_39, %c8, %c0_40] : memref<1x1x32x128xf32, #tpu.memory_space<vmem>>, vector<1x1x8x128xf32>
      %44 = vector.shape_cast %43 : vector<1x1x8x128xf32> to vector<8x128xf32>
      %45 = vector.shape_cast %42 : vector<8x128xf32> to vector<1x1x8x128xf32>
      tpu.vector_store %arg6[%c0_38, %c0_39, %c8, %c0_40], %45 {strides = array<i32>} : memref<1x1x32x128xf32, #tpu.memory_space<vmem>>, vector<1x1x8x128xf32>,
      %c0_41 = arith.constant 0 : index
      %c0_42 = arith.constant 0 : index
      %46 = vector.load %arg9[%c0_41, %c0_42] : memref<8x128xf32, #tpu.memory_space<vmem>>, vector<8x128xf32>
      %c0_43 = arith.constant 0 : index
      %c0_44 = arith.constant 0 : index
      %c16 = arith.constant 16 : index
      %c0_45 = arith.constant 0 : index
      %47 = vector.load %arg6[%c0_43, %c0_44, %c16, %c0_45] : memref<1x1x32x128xf32, #tpu.memory_space<vmem>>, vector<1x1x8x128xf32>
      %48 = vector.shape_cast %47 : vector<1x1x8x128xf32> to vector<8x128xf32>
      %49 = vector.shape_cast %46 : vector<8x128xf32> to vector<1x1x8x128xf32>
      tpu.vector_store %arg6[%c0_43, %c0_44, %c16, %c0_45], %49 {strides = array<i32>} : memref<1x1x32x128xf32, #tpu.memory_space<vmem>>, vector<1x1x8x128xf32>,
      %c0_46 = arith.constant 0 : index
      %c0_47 = arith.constant 0 : index
      %50 = vector.load %arg10[%c0_46, %c0_47] : memref<8x128xf32, #tpu.memory_space<vmem>>, vector<8x128xf32>
      %c0_48 = arith.constant 0 : index
      %c0_49 = arith.constant 0 : index
      %c24 = arith.constant 24 : index
      %c0_50 = arith.constant 0 : index
      %51 = vector.load %arg6[%c0_48, %c0_49, %c24, %c0_50] : memref<1x1x32x128xf32, #tpu.memory_space<vmem>>, vector<1x1x8x128xf32>
      %52 = vector.shape_cast %51 : vector<1x1x8x128xf32> to vector<8x128xf32>
      %53 = vector.shape_cast %50 : vector<8x128xf32> to vector<1x1x8x128xf32>
      tpu.vector_store %arg6[%c0_48, %c0_49, %c24, %c0_50], %53 {strides = array<i32>} : memref<1x1x32x128xf32, #tpu.memory_space<vmem>>, vector<1x1x8x128xf32>,
    } else {
    }
    return
  }
  func.func @transform_0(%arg0: i32, %arg1: i32, %arg2: i32) -> (i32, i32, i32) {
    %c1_i32 = arith.constant 1 : i32
    %0 = arith.muli %arg0, %c1_i32 : i32
    %1 = arith.addi %0, %arg2 : i32
    %c0_i32 = arith.constant 0 : i32
    %2 = arith.minsi %1, %c0_i32 : i32
    %c0_i32_0 = arith.constant 0 : i32
    %c0_i32_1 = arith.constant 0 : i32
    return %arg1, %2, %c0_i32_0 : i32, i32, i32
  }
  func.func @transform_1(%arg0: i32, %arg1: i32, %arg2: i32) -> (i32, i32, i32) {
    %c1_i32 = arith.constant 1 : i32
    %0 = arith.muli %arg0, %c1_i32 : i32
    %1 = arith.addi %0, %arg2 : i32
    %c0_i32 = arith.constant 0 : i32
    %2 = arith.minsi %1, %c0_i32 : i32
    %c0_i32_0 = arith.constant 0 : i32
    %c0_i32_1 = arith.constant 0 : i32
    return %arg1, %2, %c0_i32_0 : i32, i32, i32
  }
  func.func @transform_2(%arg0: i32, %arg1: i32, %arg2: i32) -> (i32, i32, i32) {
    %c1_i32 = arith.constant 1 : i32
    %0 = arith.muli %arg0, %c1_i32 : i32
    %1 = arith.addi %0, %arg2 : i32
    %c0_i32 = arith.constant 0 : i32
    %2 = arith.minsi %1, %c0_i32 : i32
    %c0_i32_0 = arith.constant 0 : i32
    %c0_i32_1 = arith.constant 0 : i32
    return %arg1, %2, %c0_i32_0 : i32, i32, i32
  }
  func.func @transform_3(%arg0: i32, %arg1: i32, %arg2: i32) -> (i32, i32, i32, i32) {
    %c0_i32 = arith.constant 0 : i32
    %c0_i32_0 = arith.constant 0 : i32
    %c0_i32_1 = arith.constant 0 : i32
    return %arg0, %arg1, %c0_i32, %c0_i32_0 : i32, i32, i32, i32
  }
}

</mosaic_0001>

<bundles_post_ra>
// kernel: tpu_custom_call.1
= control target key start
LH: loop header
LB: loop body
LE: loop exit
PB: predicated region body
PF: predicated region fallthrough
CT: control target
= control target key end

     0   :  { %s1076_s0 = inlined_call_operand.hbm [shape: f32[2,8,128], index: 0, kind: input, shape index: {}]   ;;  %s1077_s1 = inlined_call_operand.hbm [shape: f32[2,8,128], index: 1, kind: input, shape index: {}]   ;;  %s1078_s2 = inlined_call_operand.hbm [shape: f32[2,8,128], index: 2, kind: input, shape index: {}]   ;;  %s1079_s3 = inlined_call_operand.hbm [shape: f32[1,2,32,128], index: 3, kind: output, shape index: {}]  }
   0x1   :  { %1085 = sst [smem:[#allocation19_spill]] %s1077_s1 }
   0x2   :  { %8 = vsyncpa [#allocation7], 0 }
   0x3   :  { %10 = vsyncpa [#allocation7 + $0x1], 0 }
   0x4   :  { %11 = vsyncpa [#allocation10], 0 }
   0x5   :  { %13 = vsyncpa [#allocation10 + $0x1], 0 }
   0x6   :  { %14 = vsyncpa [#allocation8], 0 }
   0x7   :  { %16 = vsyncpa [#allocation8 + $0x1], 0  ;;  %s815_s12 = smov 0   ;;  %s817_s13 = smov 0  }
   0x8   :  { %s819_s14 = smov 0   ;;  %s821_s15 = smov 0  }
   0x9   :  { %s823_s16 = smov 0   ;;  %s825_s17 = smov 0  }
   0xa LB: > { %1086 = sst [smem:[#allocation16_spill]] %s783_s16  ;;  %s846_s18 = sadd.s32 4294967295, %s787_s17   ;;  %s787_s17 = sphi %s825_s17, %s22_s17   ;;  %s783_s16 = sphi %s823_s16, %s1107_s16   ;;  %s779_s15 = sphi %s821_s15, %s1106_s15   ;;  %s775_s14 = sphi %s819_s14, %s1110_s14   ;;  %s771_s13 = sphi %s817_s13, %s1109_s13   ;;  %s767_s12 = sphi %s815_s12, %s1108_s12  }
   0xb   : > { %s517_s19 = sadd.s32 4294967294, %s787_s17   ;;  %s37_s20 = sadd.s32 1, %s783_s16 }
   0xc   : > { %s56_s21 = sadd.s32 1, %s775_s14  ;;  %p39_p0 = scmp.ge.s32.totalorder %s37_s20, 2 }
   0xd   : > { %p63_p1 = scmp.ne.s32.totalorder %s775_s14, %s771_s13  ;;  %p64_p2 = scmp.eq.s32.totalorder %s787_s17, 0 }
   0xe   : > { %p69_p3 = scmp.ne.s32.totalorder %s771_s13, %s767_s12  ;;  %s1112_s20 = smov (%p39_p0, %s37_s20), 0 }
   0xf   : > { %1087 = sst [smem:[#allocation17_spill]] %s1112_s20  ;;  %p858_p4 = por %p64_p2, %p63_p1 }
  0x10   : > { %p70_p5 = scmp.eq.s32.totalorder %s846_s18, 0  ;;  %s51_s23 = ssub.s32 %s783_s16, %s1112_s20 }
  0x11   : > { %p163_p6 = scmp.eq.s32.totalorder %s846_s18, 1  ;;  %p54_p7 = scmp.eq.s32.totalorder %s51_s23, 0 }
  0x12   : > { %p866_p8 = por %p70_p5, %p69_p3  ;;  %p169_p10 = scmp.eq.s32.totalorder %s517_s19, 1 }
  0x13   : > { %p870_p9 = por %p163_p6, %p63_p1  ;;  %p559_p13 = scmp.lt.s32.totalorder %s787_s17, 2 }
  0x14   : > { %s1089_s24 = scalar_select %p866_p8, 1, 0 }
  0x15   : > { %s1090_s25 = scalar_select %p870_p9, 1, 0 }
  0x16   : > { %s875_s26 = scalar_select %p54_p7, %s775_s14, %s56_s21  }
  0x17   : > { %p877_p11 = por %p169_p10, %p69_p3  ;;  %s189_s28 = sand.u32 1, %s775_s14  }
  0x18   : > { %1091 = sst [smem:[#allocation18_spill]] %s875_s26  ;;  %s886_s29 = sshll.u32 %s189_s28, 3 }
  0x19   : > { %s1092_s27 = scalar_select %p877_p11, 1, 0 }
  0x1a   : > { %s889_s30 = sshll.u32 %s783_s16, 7  ;;  %p893_p0 = pnand %p559_p13, %p858_p4 }
  0x1b   : > { %s211_s5 = sand.u32 1, %s787_s17   ;;  %s1094_s1 = sld [smem:[#allocation19_spill]] }
  0x1c   : > { %s1093_s4 = scalar_select %p893_p0, 1, 0 }
  0x1d   : > { %s215_s9 = scalar_lea.vmem [#allocation9], %s886_s29  ;;  %s909_s11 = scalar_lea.sflag [#allocation10], %s211_s5 }
  0x1e   : > { %s226_s10 = sshll.u32 %s215_s9, 4  ;;  %p915_p4 = pneg %p893_p0  ;;  %s906_s10 = int_to_ptr.vmem [resolvable:$true] %s226_s10 }
  0x21   : > { %s902_s8 = scalar_lea.hbm %s1094_s1, %s889_s30  ;;  %s616_s6 = scalar_lea.hbm %s1094_s1, 256 }
  0x22   : > { %s611_s19 = scalar_lea.hbm %s902_s8, 128  ;;  %p617_p7 = scmp.lt.u32.totalorder %s902_s8, %s1094_s1 }
  0x23   : > { %p612_p3 = scmp.ne.s32.totalorder %s902_s8, %s611_s19  ;;  %p618_p10 = scmp.lt.u32.totalorder %s616_s6, %s611_s19 }
  0x24   : > { %p620_p12 = scmp.lt.u32.totalorder %s611_s19, %s902_s8 }
  0x25   : > { %p614_p5 = pnand %p915_p4, %p612_p3  ;;  %p619_p13 = por %p618_p10, %p617_p7 }
  0x27   : > { %p615_p6 = pneg %p614_p5  ;;  %p621_p1 = por %p620_p12, %p619_p13 }
  0x29   : > { %p622_p2 = pnand %p621_p1, %p615_p6 }
  0x2b   : > { %625 = shalt.err (!%p622_p2)
}
  0x2c   : > { %s626_s5 = scalar_lea.vmem %s906_s10, 128  ;;  %s789_s22 = smov [#allocation9]  }
  0x2d   : > { %p627_p3 = scmp.ne.s32.totalorder %s906_s10, %s626_s5  ;;  %s631_s23 = sshll.u32 %s789_s22, 4  ;;  %s632_s23 = int_to_ptr.vmem [resolvable:$false] %s631_s23 }
  0x2e   : > { %s633_s7 = scalar_lea.vmem %s632_s23, 256  ;;  %p634_p9 = scmp.lt.s32.totalorder %s906_s10, %s632_s23 }
  0x2f   : > { %p629_p5 = pnand %p627_p3, %p915_p4  ;;  %p635_p8 = scmp.lt.s32.totalorder %s633_s7, %s626_s5 }
  0x31   : > { %p630_p11 = pneg %p629_p5  ;;  %p636_p7 = por %p635_p8, %p634_p9 }
  0x33   : > { %p637_p10 = pnand %p636_p7, %p630_p11 }
  0x35   : > { %640 = shalt.err (!%p637_p10)
}
  0x36   : > { %551 = dma.hbm_to_vmem [thread:$0]  (!%p893_p0), %s902_s8, 128, %s906_s10, %s909_s11  }
  0x37   : > { %p1096_p12 = scmp.lt.s32.totalorder %s787_s17, 3  ;;  %p1097_p1 = scmp.ge.s32.totalorder %s787_s17, 1 }
  0x38   : > { %s951_s5 = scalar_lea.hbm %s1076_s0, %s889_s30  ;;  %s193_s22 = scalar_lea.vmem [#allocation6], %s886_s29 }
  0x39   : > { %p943_p2 = pnand %p1097_p1, %p1096_p12  ;;  %s204_s23 = sshll.u32 %s193_s22, 4  ;;  %s954_s23 = int_to_ptr.vmem [resolvable:$true] %s204_s23 }
  0x3a   : > { %s960_s7 = scalar_lea.hbm %s1078_s2, %s889_s30  ;;  %s190_s1 = scalar_lea.sflag [#allocation7], %s189_s28 }
  0x3b   : > { %s1098_s19 = scalar_select %p943_p2, 1, 0 }
  0x3c   : > { %s641_s20 = scalar_lea.hbm %s951_s5, 128  ;;  %s646_s16 = scalar_lea.hbm %s1076_s0, 256 }
  0x3d   : > { %p642_p8 = scmp.ne.s32.totalorder %s951_s5, %s641_s20  ;;  %p647_p6 = scmp.lt.u32.totalorder %s951_s5, %s1076_s0 }
  0x3e   : > { %p648_p13 = scmp.lt.u32.totalorder %s646_s16, %s641_s20  ;;  %p650_p5 = scmp.lt.u32.totalorder %s641_s20, %s951_s5 }
  0x3f   : > { %p644_p9 = pnand %p642_p8, %p915_p4 }
  0x40   : > { %p649_p3 = por %p648_p13, %p647_p6 }
  0x41   : > { %p645_p11 = pneg %p644_p9 }
  0x42   : > { %p651_p7 = por %p650_p5, %p649_p3 }
  0x44   : > { %p652_p10 = pnand %p651_p7, %p645_p11 }
  0x46   : > { %655 = shalt.err (!%p652_p10)
}
  0x47   : > { %s656_s28 = scalar_lea.vmem %s954_s23, 128  ;;  %s790_s30 = smov [#allocation6]  }
  0x48   : > { %p657_p12 = scmp.ne.s32.totalorder %s954_s23, %s656_s28  ;;  %s661_s8 = sshll.u32 %s790_s30, 4  ;;  %s662_s8 = int_to_ptr.vmem [resolvable:$false] %s661_s8 }
  0x49   : > { %s663_s26 = scalar_lea.vmem %s662_s8, 256  ;;  %p664_p9 = scmp.lt.s32.totalorder %s954_s23, %s662_s8 }
  0x4a   : > { %p659_p1 = pnand %p657_p12, %p915_p4  ;;  %p665_p2 = scmp.lt.s32.totalorder %s663_s26, %s656_s28 }
  0x4c   : > { %p660_p8 = pneg %p659_p1  ;;  %p666_p6 = por %p665_p2, %p664_p9 }
  0x4e   : > { %p667_p13 = pnand %p666_p6, %p660_p8 }
  0x50   : > { %670 = shalt.err (!%p667_p13)
}
  0x51   : > { %548 = dma.hbm_to_vmem [thread:$0]  (!%p893_p0), %s951_s5, 128, %s954_s23, %s190_s1  }
  0x52   : > { %s237_s16 = scalar_lea.vmem [#allocation11], %s886_s29  ;;  %s671_s10 = scalar_lea.hbm %s960_s7, 128 }
  0x53   : > { %s248_s20 = sshll.u32 %s237_s16, 4  ;;  %p672_p11 = scmp.ne.s32.totalorder %s960_s7, %s671_s10  ;;  %s249_s20 = int_to_ptr.vmem [resolvable:$true] %s248_s20 }
  0x54   : > { %s676_s22 = scalar_lea.hbm %s1078_s2, 256  ;;  %p677_p5 = scmp.lt.u32.totalorder %s960_s7, %s1078_s2 }
  0x55   : > { %p674_p2 = pnand %p672_p11, %p915_p4  ;;  %p678_p7 = scmp.lt.u32.totalorder %s676_s22, %s671_s10 }
  0x56   : > { %p680_p12 = scmp.lt.u32.totalorder %s671_s10, %s960_s7 }
  0x57   : > { %p675_p3 = pneg %p674_p2  ;;  %p679_p10 = por %p678_p7, %p677_p5 }
  0x59   : > { %p681_p1 = por %p680_p12, %p679_p10 }
  0x5b   : > { %p682_p8 = pnand %p681_p1, %p675_p3 }
  0x5d   : > { %685 = shalt.err (!%p682_p8)
}
  0x5e   : > { %s686_s1 = scalar_lea.vmem %s249_s20, 128  ;;  %s791_s29 = smov [#allocation11]  }
  0x5f   : > { %p687_p9 = scmp.ne.s32.totalorder %s249_s20, %s686_s1  ;;  %s691_s5 = sshll.u32 %s791_s29, 4  ;;  %s692_s5 = int_to_ptr.vmem [resolvable:$false] %s691_s5 }
  0x60   : > { %s693_s23 = scalar_lea.vmem %s692_s5, 256  ;;  %p694_p11 = scmp.lt.s32.totalorder %s249_s20, %s692_s5 }
  0x61   : > { %p689_p6 = pnand %p687_p9, %p915_p4  ;;  %p695_p2 = scmp.lt.s32.totalorder %s693_s23, %s686_s1 }
  0x63   : > { %p690_p13 = pneg %p689_p6  ;;  %p696_p0 = por %p695_p2, %p694_p11 }
  0x65   : > { %p697_p5 = pnand %p696_p0, %p690_p13 }
  0x67   : > { %700 = shalt.err (!%p697_p5)
}
  0x68   : > { %p1099_p7 = scmp.ne.s32.totalorder %s1093_s4, 0  ;;  %p1100_p3 = scmp.ne.s32.totalorder %s1098_s19, 0 }
  0x69   : > { %s1007_s21 = sand.u32 (!%p1100_p3), 1, %s771_s13   ;;  %p1101_p4 = scmp.ne.s32.totalorder (!%p1100_p3), %s1089_s24, 0 }
  0x6a   : > { %554 = dma.hbm_to_vmem [thread:$0]  (!%p1099_p7), %s960_s7, 128, %s249_s20, %s909_s11  }
  0x6b   : > { %257 = sbr.rel (%p1100_p3) target bundleno = 146 (0x92), region = 32  ;;  %s527_s8 = sshll.u32 (!%p1100_p3), %s1007_s21, 3 }
  0x6c   : > { %s260_s26 = scalar_lea.sflag (!%p1100_p3), [#allocation7], %s1007_s21  ;;  %s263_s16 = scalar_lea.vmem (!%p1100_p3), [#allocation6], %s527_s8 }
  0x72   : > { %754 = dma.done.wait (%p1101_p4), %s260_s26, 128  }
  0x73   : > { %756 = vsyncadd (%p1101_p4), %s260_s26, 4294967168  ;;  %s268_s4 = sand.u32 1, %s846_s18   ;;  %s272_s19 = scalar_lea.vmem [#allocation9], %s527_s8 }
  0x74   : > { %s269_s11 = scalar_lea.sflag [#allocation10], %s268_s4 }
  0x75   : > { %758 = dma.done.wait (%p1101_p4), %s269_s11, 256  }
  0x76   : > { %760 = vsyncadd (%p1101_p4), %s269_s11, 4294967040  ;;  %s530_s7 = sshll.u32 %s1007_s21, 5  ;;  %s536_s6 = sshll.u32 %s779_s15, 9  ;;  %v331_v0 = vld [vmem:[%s272_s19] sm:$0xff]  ;;  %v332_v1 = vld [vmem:[%s263_s16] sm:$0xff] }
  0x77   : > { %s313_s20 = scalar_lea.vmem [#allocation12], %s530_s7  ;;  %s281_s9 = scalar_lea.vmem [#allocation11], %s527_s8  ;;  %v333_v3 = vsub.f32 %v332_v1, %v331_v0 }
  0x78   : > { %s383_s10 = sshll.u32 %s313_s20, 4  ;;  %v344_v2 = vld [vmem:[%s281_s9] sm:$0xff]  ;;  %s1027_s24 = scalar_lea.hbm %s1079_s3, %s536_s6  ;;  %s1022_s10 = int_to_ptr.vmem [resolvable:$true] %s383_s10 }
  0x79   : > { %v345_v4 = vsub.f32 %v344_v2, %v331_v0  ;;  %v335_v5 = vand.u32 2147483647, %v333_v3  ;;  %v340_v6 = vmul.f32 %v333_v3, %v333_v3  ;;  %s368_s15 = scalar_lea.sflag [#allocation8], %s1007_s21  ;;  %s701_s28 = scalar_lea.vmem %s1022_s10, 512 }
  0x7a   : > { %p702_p0 = scmp.ne.s32.totalorder %s1022_s10, %s701_s28  ;;  %p1102_p10 = scmp.ne.s32.totalorder %s1090_s25, 0 }
  0x7b   : > { %v347_v7 = vand.u32 2147483647, %v345_v4  ;;  %v352_v8 = vmul.f32 %v345_v4, %v345_v4  ;;  %360 = vst [vmem:[%s313_s20] sm:$0xff] %v335_v5  ;;  %362 = vst [vmem:[%s313_s20 + $0x8] sm:$0xff] %v340_v6  ;;  %s792_s30 = smov [#allocation12]  }
  0x7c   : > { %p703_p12 = pnand %p702_p0, %p1102_p10  ;;  %s705_s1 = sshll.u32 %s792_s30, 4  ;;  %s706_s1 = int_to_ptr.vmem [resolvable:$false] %s705_s1 }
  0x7d   : > { %364 = vst [vmem:[%s313_s20 + $0x10] sm:$0xff] %v347_v7  ;;  %366 = vst [vmem:[%s313_s20 + $0x18] sm:$0xff] %v352_v8  ;;  %s707_s29 = scalar_lea.vmem %s706_s1, 1024  ;;  %p708_p8 = scmp.lt.s32.totalorder %s1022_s10, %s706_s1 }
  0x7e   : > { %p704_p1 = pneg %p703_p12  ;;  %p709_p9 = scmp.lt.s32.totalorder %s707_s29, %s701_s28 }
  0x80   : > { %p710_p6 = por %p709_p9, %p708_p8 }
  0x82   : > { %p711_p13 = pnand %p710_p6, %p704_p1 }
  0x84   : > { %714 = shalt.err (!%p711_p13)
}
  0x85   : > { %s715_s5 = scalar_lea.hbm %s1027_s24, 512  ;;  %s719_s26 = scalar_lea.hbm %s1079_s3, 1024 }
  0x86   : > { %p716_p11 = scmp.ne.s32.totalorder %s1027_s24, %s715_s5  ;;  %p720_p7 = scmp.lt.u32.totalorder %s1027_s24, %s1079_s3 }
  0x87   : > { %p721_p3 = scmp.lt.u32.totalorder %s719_s26, %s715_s5  ;;  %p723_p0 = scmp.lt.u32.totalorder %s715_s5, %s1027_s24 }
  0x88   : > { %p717_p2 = pnand %p716_p11, %p1102_p10 }
  0x89   : > { %p722_p4 = por %p721_p3, %p720_p7 }
  0x8a   : > { %p718_p5 = pneg %p717_p2 }
  0x8b   : > { %p724_p12 = por %p723_p0, %p722_p4 }
  0x8d   : > { %p725_p1 = pnand %p724_p12, %p718_p5 }
  0x8f   : > { %728 = shalt.err (!%p725_p1)
}
  0x90   : > { %s793_s11 = smov 128   ;;  %s794_s19 = smov 8  }
  0x91   : > { %543 = dma.vmem_to_hbm [thread:$0]  (%p1102_p10), %s1022_s10, 512, %s1027_s24, %s368_s15, %s793_s11, %s793_s11, %s794_s19  }
  0x92 PF: > { %s398_s7 = sand.u32 1, %s767_s12   ;;  %p1103_p8 = scmp.ne.s32.totalorder %s1092_s27, 0 }
  0x93   : > { %p1104_p9 = scmp.ge.s32.totalorder %s787_s17, 2  ;;  %s399_s20 = scalar_lea.sflag [#allocation8], %s398_s7 }
  0x95   : > { %p556_p6 = pnand %p1104_p9, %p1103_p8 }
  0x97   : > { %762 = dma.done.wait (!%p556_p6), %s399_s20, 512  }
  0x98   : > { %764 = vsyncadd (!%p556_p6), %s399_s20, 4294966784  ;;  %s22_s17 = sadd.s32 1, %s787_s17   ;;  %s1105_s6 = sld [smem:[#allocation18_spill]] }
  0x99   : > { %p19_p13 = scmp.ge.s32.totalorder %s22_s17, 4   ;;  %s1106_s15 = sld [smem:[#allocation16_spill]] }
  0x9a   : > { %s1107_s16 = sld [smem:[#allocation17_spill]]  ;;  %s1108_s12 = smov %s771_s13 }
  0x9b   : > { %s1109_s13 = smov %s775_s14  ;;  %21 = sbr.rel (!%p19_p13) target bundleno = 10 (0xa), region = 109 }
  0x9e   : > { %s1110_s14 = smov %s1105_s6 }
  0xa2   :  { %404 = vsyncpa [#allocation7], 1 }
  0xa3   :  { %406 = vsyncpa [#allocation7 + $0x1], 1 }
  0xa4   :  { %407 = vsyncpa [#allocation10], 1 }
  0xa5   :  { %409 = vsyncpa [#allocation10 + $0x1], 1 }
  0xa6   :  { %410 = vsyncpa [#allocation8], 1 }
  0xa7   :  { %412 = vsyncpa [#allocation8 + $0x1], 1 }

</bundles_post_ra>
